<compile_context>
chip_gen: v7x
topology: tpu7x:2x2x1
jax: 0.10.0
libtpu: 0.0.40
codegen_flags: <defaults>
</compile_context>

<pallas_src>
import functools

import jax
import jax.numpy as jnp
from jax.experimental import pallas as pl
from jax.experimental.pallas import tpu as pltpu


def _mlp_kernel(n_layers, *refs):
    """Fused MLP kernel.

    refs layout:
      (x_ref, a_ref, w0x, w0a, b0, w1, b1, ..., w_{L-1}, b_{L-1}, o_ref)
    Activations/output are blocked along the batch axis; weights/biases are
    full-array VMEM-resident blocks. Weights are bf16, biases f32, all dots
    accumulate in f32 on the MXU.
    """
    x_ref, a_ref, w0x_ref, w0a_ref, b0_ref = refs[:5]
    o_ref = refs[-1]
    wb_refs = refs[5:-1]

    # First layer: split matmul replaces torch.cat((x, actions), dim=1).
    h = (jnp.dot(x_ref[...], w0x_ref[...], preferred_element_type=jnp.float32)
         + jnp.dot(a_ref[...], w0a_ref[...], preferred_element_type=jnp.float32)
         + b0_ref[...])
    if n_layers > 1:
        h = jnp.maximum(h, 0.0)

    # Remaining layers (ReLU on all but the final one).
    for i in range(1, n_layers):
        w = wb_refs[2 * (i - 1)]          # (in_i, out_i) bf16
        b = wb_refs[2 * (i - 1) + 1]      # (1, out_i)   f32
        h = jnp.dot(h.astype(w.dtype), w[...],
                    preferred_element_type=jnp.float32) + b[...]
        if i < n_layers - 1:
            h = jnp.maximum(h, 0.0)

    o_ref[...] = h.astype(o_ref.dtype)    # lane-dense (TB, 128k) store


def mlp_forward(x, actions, weights, biases, *, block_b=128,
                compute_dtype=jnp.bfloat16):
    """Run the fused MLP Pallas kernel.

    x:       (B, obs_dim)  float32
    actions: (B, act_dim)  float32
    weights: list of (in_i, out_i) float32 arrays (torch weight transposed)
    biases:  list of (1, out_i)    float32 arrays
    Returns (B, out_dim) float32.
    """
    n_layers = len(weights)
    assert n_layers >= 2, "expects at least one hidden layer"
    B, obs_dim = x.shape
    act_dim = actions.shape[1]
    out_dim = weights[-1].shape[1]

    # --- Split first weight (it maps the concatenated [x, actions] features).
    w0 = weights[0]
    assert w0.shape[0] == obs_dim + act_dim, "dims[0] must equal obs+act width"
    w0x = w0[:obs_dim, :]
    w0a = w0[obs_dim:, :]

    # --- Pad the final layer's output features to a 128-lane multiple so the
    #     kernel's output store is unmasked / lane-dense.
    out_pad = ((out_dim + 127) // 128) * 128
    w_last = weights[-1]
    b_last = biases[-1]
    if out_pad != out_dim:
        w_last = jnp.pad(w_last, ((0, 0), (0, out_pad - out_dim)))
        b_last = jnp.pad(b_last, ((0, 0), (0, out_pad - out_dim)))

    # --- Batch tiling: pad B up to a multiple of the tile (sublane-aligned)
    #     so every grid step sees a full block.
    tb = max(8, min(block_b, ((B + 7) // 8) * 8))
    tb = ((tb + 7) // 8) * 8
    b_pad = ((B + tb - 1) // tb) * tb
    x_p = x if b_pad == B else jnp.pad(x, ((0, b_pad - B), (0, 0)))
    a_p = actions if b_pad == B else jnp.pad(actions, ((0, b_pad - B), (0, 0)))
    grid = (b_pad // tb,)

    cast = lambda a: a.astype(compute_dtype)
    batch_spec = lambda feat: pl.BlockSpec((tb, feat), lambda i: (i, 0))
    resident_spec = lambda shp: pl.BlockSpec(shp, lambda i: (0, 0))

    in_specs = [
        batch_spec(obs_dim),                       # x
        batch_spec(act_dim),                       # actions
        resident_spec(w0x.shape),                  # W0_x
        resident_spec(w0a.shape),                  # W0_a
        resident_spec(biases[0].shape),            # b0
    ]
    operands = [cast(x_p), cast(a_p), cast(w0x), cast(w0a), biases[0]]

    for i in range(1, n_layers):
        w = w_last if i == n_layers - 1 else weights[i]
        b = b_last if i == n_layers - 1 else biases[i]
        in_specs.append(resident_spec(w.shape))
        in_specs.append(resident_spec(b.shape))
        operands.append(cast(w))
        operands.append(b)

    flops = 2 * b_pad * sum(int(w.shape[0]) * int(w.shape[1]) for w in weights)
    bytes_accessed = (
        (x_p.size + a_p.size) * 2                      # bf16 activations
        + sum(int(w.size) for w in weights) * 2        # bf16 weights
        + sum(int(b.size) for b in biases) * 4         # f32 biases
        + b_pad * out_pad * 4                          # f32 padded output
    )

    kernel = functools.partial(_mlp_kernel, n_layers)

    out_padded = pl.pallas_call(
        kernel,
        out_shape=jax.ShapeDtypeStruct((b_pad, out_pad), jnp.float32),
        grid=grid,
        in_specs=in_specs,
        out_specs=pl.BlockSpec((tb, out_pad), lambda i: (i, 0)),
        compiler_params=pltpu.CompilerParams(
            dimension_semantics=("parallel",)),
        cost_estimate=pl.CostEstimate(
            flops=flops, transcendentals=0, bytes_accessed=bytes_accessed),
    )(*operands)

    return out_padded[:B, :out_dim]


def init_mlp_params(key, dims):
    """Deterministic init mimicking nn.Linear's U(-1/sqrt(fan_in), 1/sqrt(fan_in)).

    Returns weights as (in, out) (i.e. torch weight transposed) and biases (1, out).
    """
    weights, biases = [], []
    for i in range(len(dims) - 1):
        fan_in, fan_out = dims[i], dims[i + 1]
        key, kw, kb = jax.random.split(key, 3)
        bound = 1.0 / jnp.sqrt(jnp.float32(fan_in))
        w = jax.random.uniform(kw, (fan_in, fan_out), jnp.float32, -bound, bound)
        b = jax.random.uniform(kb, (1, fan_out), jnp.float32, -bound, bound)
        weights.append(w)
        biases.append(b)
    return weights, biases


def mlp_reference(x, actions, weights, biases, compute_dtype=None):
    """Pure-JAX reference. compute_dtype=bf16 mirrors the kernel's numerics."""
    h = jnp.concatenate([x, actions], axis=1)
    for i, (w, b) in enumerate(zip(weights, biases)):
        if compute_dtype is not None:
            hc, wc = h.astype(compute_dtype), w.astype(compute_dtype)
        else:
            hc, wc = h, w
        h = jnp.dot(hc, wc, preferred_element_type=jnp.float32) + b
        if i < len(weights) - 1:
            h = jnp.maximum(h, 0.0)
    return h


if __name__ == "__main__":
    key = jax.random.PRNGKey(0)

    batch = 96           # not a multiple of block_b -> exercises the batch pad
    obs_dim = 24
    act_dim = 8
    # dims[0] must equal obs_dim + act_dim (the concat width).
    dims = [obs_dim + act_dim, 32, 32, 4]

    key, kx, ka, kp = jax.random.split(key, 4)
    x = jax.random.normal(kx, (batch, obs_dim), jnp.float32)
    actions = jax.random.normal(ka, (batch, act_dim), jnp.float32)
    weights, biases = init_mlp_params(kp, dims)

    out = mlp_forward(x, actions, weights, biases, block_b=64)
    out = jax.block_until_ready(out)
    assert out.shape == (batch, dims[-1])

    # Tight check against a reference using the same bf16-in / f32-accumulate
    # numerics as the kernel.
    ref_bf16 = mlp_reference(x, actions, weights, biases,
                             compute_dtype=jnp.bfloat16)
    assert jnp.allclose(out, ref_bf16, atol=2e-3, rtol=2e-3), \
        "mismatch vs bf16 reference"

    # Loose sanity check against the f32 PyTorch-equivalent reference
    # (expected small drift from the bf16 operand cast).
    ref_f32 = mlp_reference(x, actions, weights, biases)
    assert jnp.allclose(out, ref_f32, atol=5e-2, rtol=5e-2), \
        "mismatch vs f32 reference"

    print("KERNEL_OK")
</pallas_src>

<mosaic_0001>
module attributes {stable_mosaic.version = 11 : i64} {
  func.func @_mlp_kernel(%arg0: i32, %arg1: memref<64x24xbf16, #tpu.memory_space<vmem>>, %arg2: memref<64x8xbf16, #tpu.memory_space<vmem>>, %arg3: memref<24x32xbf16, #tpu.memory_space<vmem>>, %arg4: memref<8x32xbf16, #tpu.memory_space<vmem>>, %arg5: memref<1x32xf32, #tpu.memory_space<vmem>>, %arg6: memref<32x32xbf16, #tpu.memory_space<vmem>>, %arg7: memref<1x32xf32, #tpu.memory_space<vmem>>, %arg8: memref<32x128xbf16, #tpu.memory_space<vmem>>, %arg9: memref<1x128xf32, #tpu.memory_space<vmem>>, %arg10: memref<64x128xf32, #tpu.memory_space<vmem>>) attributes {dimension_semantics = [#tpu.dimension_semantics<parallel>], iteration_bounds = array<i64: 2>, scalar_prefetch = 0 : i64, scratch_operands = 0 : i64, tpu.core_type = #tpu.core_type<tc>, window_params = [{transform_indices = @transform_0, window_bounds = array<i64: 64, 24>}, {transform_indices = @transform_1, window_bounds = array<i64: 64, 8>}, {pipeline_mode = #tpu.pipeline_mode<synchronous>, transform_indices = @transform_2, window_bounds = array<i64: 24, 32>}, {pipeline_mode = #tpu.pipeline_mode<synchronous>, transform_indices = @transform_3, window_bounds = array<i64: 8, 32>}, {pipeline_mode = #tpu.pipeline_mode<synchronous>, transform_indices = @transform_4, window_bounds = array<i64: 1, 32>}, {pipeline_mode = #tpu.pipeline_mode<synchronous>, transform_indices = @transform_5, window_bounds = array<i64: 32, 32>}, {pipeline_mode = #tpu.pipeline_mode<synchronous>, transform_indices = @transform_6, window_bounds = array<i64: 1, 32>}, {pipeline_mode = #tpu.pipeline_mode<synchronous>, transform_indices = @transform_7, window_bounds = array<i64: 32, 128>}, {pipeline_mode = #tpu.pipeline_mode<synchronous>, transform_indices = @transform_8, window_bounds = array<i64: 1, 128>}, {transform_indices = @transform_9, window_bounds = array<i64: 64, 128>}]} {
    %c0 = arith.constant 0 : index
    %c0_0 = arith.constant 0 : index
    %0 = vector.load %arg1[%c0, %c0_0] : memref<64x24xbf16, #tpu.memory_space<vmem>>, vector<64x24xbf16>
    %c0_1 = arith.constant 0 : index
    %c0_2 = arith.constant 0 : index
    %1 = vector.load %arg3[%c0_1, %c0_2] : memref<24x32xbf16, #tpu.memory_space<vmem>>, vector<24x32xbf16>
    %cst = arith.constant dense<0.000000e+00> : vector<64x32xf32>
    %2 = tpu.matmul %0, %1, %cst {dimension_numbers = #tpu.dot_dimension_numbers<[1], [0], [0], [1], [0, 0, 1, 1], [], []>} : vector<64x24xbf16>, vector<24x32xbf16>, vector<64x32xf32> -> vector<64x32xf32>
    %c0_3 = arith.constant 0 : index
    %c0_4 = arith.constant 0 : index
    %3 = vector.load %arg2[%c0_3, %c0_4] : memref<64x8xbf16, #tpu.memory_space<vmem>>, vector<64x8xbf16>
    %c0_5 = arith.constant 0 : index
    %c0_6 = arith.constant 0 : index
    %4 = vector.load %arg4[%c0_5, %c0_6] : memref<8x32xbf16, #tpu.memory_space<vmem>>, vector<8x32xbf16>
    %cst_7 = arith.constant dense<0.000000e+00> : vector<64x32xf32>
    %5 = tpu.matmul %3, %4, %cst_7 {dimension_numbers = #tpu.dot_dimension_numbers<[1], [0], [0], [1], [0, 0, 1, 1], [], []>} : vector<64x8xbf16>, vector<8x32xbf16>, vector<64x32xf32> -> vector<64x32xf32>
    %6 = arith.addf %2, %5 : vector<64x32xf32>
    %c0_8 = arith.constant 0 : index
    %c0_9 = arith.constant 0 : index
    %7 = vector.load %arg5[%c0_8, %c0_9] : memref<1x32xf32, #tpu.memory_space<vmem>>, vector<1x32xf32>
    %8 = vector.broadcast %7 : vector<1x32xf32> to vector<64x32xf32>
    %9 = arith.addf %6, %8 : vector<64x32xf32>
    %cst_10 = arith.constant 0.000000e+00 : f32
    %10 = vector.broadcast %cst_10 : f32 to vector<64x32xf32>
    %11 = arith.maximumf %9, %10 : vector<64x32xf32>
    %12 = arith.truncf %11 : vector<64x32xf32> to vector<64x32xbf16>
    %c0_11 = arith.constant 0 : index
    %c0_12 = arith.constant 0 : index
    %13 = vector.load %arg6[%c0_11, %c0_12] : memref<32x32xbf16, #tpu.memory_space<vmem>>, vector<32x32xbf16>
    %cst_13 = arith.constant dense<0.000000e+00> : vector<64x32xf32>
    %14 = tpu.matmul %12, %13, %cst_13 {dimension_numbers = #tpu.dot_dimension_numbers<[1], [0], [0], [1], [0, 0, 1, 1], [], []>} : vector<64x32xbf16>, vector<32x32xbf16>, vector<64x32xf32> -> vector<64x32xf32>
    %c0_14 = arith.constant 0 : index
    %c0_15 = arith.constant 0 : index
    %15 = vector.load %arg7[%c0_14, %c0_15] : memref<1x32xf32, #tpu.memory_space<vmem>>, vector<1x32xf32>
    %16 = vector.broadcast %15 : vector<1x32xf32> to vector<64x32xf32>
    %17 = arith.addf %14, %16 : vector<64x32xf32>
    %cst_16 = arith.constant 0.000000e+00 : f32
    %18 = vector.broadcast %cst_16 : f32 to vector<64x32xf32>
    %19 = arith.maximumf %17, %18 : vector<64x32xf32>
    %20 = arith.truncf %19 : vector<64x32xf32> to vector<64x32xbf16>
    %c0_17 = arith.constant 0 : index
    %c0_18 = arith.constant 0 : index
    %21 = vector.load %arg8[%c0_17, %c0_18] : memref<32x128xbf16, #tpu.memory_space<vmem>>, vector<32x128xbf16>
    %cst_19 = arith.constant dense<0.000000e+00> : vector<64x128xf32>
    %22 = tpu.matmul %20, %21, %cst_19 {dimension_numbers = #tpu.dot_dimension_numbers<[1], [0], [0], [1], [0, 0, 1, 1], [], []>} : vector<64x32xbf16>, vector<32x128xbf16>, vector<64x128xf32> -> vector<64x128xf32>
    %c0_20 = arith.constant 0 : index
    %c0_21 = arith.constant 0 : index
    %23 = vector.load %arg9[%c0_20, %c0_21] : memref<1x128xf32, #tpu.memory_space<vmem>>, vector<1x128xf32>
    %24 = vector.broadcast %23 : vector<1x128xf32> to vector<64x128xf32>
    %25 = arith.addf %22, %24 : vector<64x128xf32>
    %c0_22 = arith.constant 0 : index
    %c0_23 = arith.constant 0 : index
    %26 = vector.load %arg10[%c0_22, %c0_23] : memref<64x128xf32, #tpu.memory_space<vmem>>, vector<64x128xf32>
    tpu.vector_store %arg10[%c0_22, %c0_23], %25 {strides = array<i32>} : memref<64x128xf32, #tpu.memory_space<vmem>>, vector<64x128xf32>,
    return
  }
  func.func @transform_0(%arg0: i32) -> (i32, i32) {
    %c0_i32 = arith.constant 0 : i32
    %c0_i32_0 = arith.constant 0 : i32
    return %arg0, %c0_i32 : i32, i32
  }
  func.func @transform_1(%arg0: i32) -> (i32, i32) {
    %c0_i32 = arith.constant 0 : i32
    %c0_i32_0 = arith.constant 0 : i32
    return %arg0, %c0_i32 : i32, i32
  }
  func.func @transform_2(%arg0: i32) -> (i32, i32) {
    %c0_i32 = arith.constant 0 : i32
    %c0_i32_0 = arith.constant 0 : i32
    %c0_i32_1 = arith.constant 0 : i32
    return %c0_i32, %c0_i32_0 : i32, i32
  }
  func.func @transform_3(%arg0: i32) -> (i32, i32) {
    %c0_i32 = arith.constant 0 : i32
    %c0_i32_0 = arith.constant 0 : i32
    %c0_i32_1 = arith.constant 0 : i32
    return %c0_i32, %c0_i32_0 : i32, i32
  }
  func.func @transform_4(%arg0: i32) -> (i32, i32) {
    %c0_i32 = arith.constant 0 : i32
    %c0_i32_0 = arith.constant 0 : i32
    %c0_i32_1 = arith.constant 0 : i32
    return %c0_i32, %c0_i32_0 : i32, i32
  }
  func.func @transform_5(%arg0: i32) -> (i32, i32) {
    %c0_i32 = arith.constant 0 : i32
    %c0_i32_0 = arith.constant 0 : i32
    %c0_i32_1 = arith.constant 0 : i32
    return %c0_i32, %c0_i32_0 : i32, i32
  }
  func.func @transform_6(%arg0: i32) -> (i32, i32) {
    %c0_i32 = arith.constant 0 : i32
    %c0_i32_0 = arith.constant 0 : i32
    %c0_i32_1 = arith.constant 0 : i32
    return %c0_i32, %c0_i32_0 : i32, i32
  }
  func.func @transform_7(%arg0: i32) -> (i32, i32) {
    %c0_i32 = arith.constant 0 : i32
    %c0_i32_0 = arith.constant 0 : i32
    %c0_i32_1 = arith.constant 0 : i32
    return %c0_i32, %c0_i32_0 : i32, i32
  }
  func.func @transform_8(%arg0: i32) -> (i32, i32) {
    %c0_i32 = arith.constant 0 : i32
    %c0_i32_0 = arith.constant 0 : i32
    %c0_i32_1 = arith.constant 0 : i32
    return %c0_i32, %c0_i32_0 : i32, i32
  }
  func.func @transform_9(%arg0: i32) -> (i32, i32) {
    %c0_i32 = arith.constant 0 : i32
    %c0_i32_0 = arith.constant 0 : i32
    return %arg0, %c0_i32 : i32, i32
  }
}

</mosaic_0001>

<bundles_post_ra>
// kernel: tpu_custom_call.1
= control target key start
LH: loop header
LB: loop body
LE: loop exit
PB: predicated region body
PF: predicated region fallthrough
CT: control target
= control target key end

     0   :  { %14 = vsyncpa [#allocation3], 0  ;;  %s1379_s0 = inlined_call_operand.vmem [shape: bf16[128,24], index: 0, kind: input, shape index: {}]   ;;  %s1380_s1 = inlined_call_operand.vmem [shape: bf16[128,8], index: 1, kind: input, shape index: {}]   ;;  %s1381_s2 = inlined_call_operand.vmem [shape: bf16[24,32], index: 2, kind: input, shape index: {}]   ;;  %s1382_s3 = inlined_call_operand.vmem [shape: bf16[8,32], index: 3, kind: input, shape index: {}]   ;;  %s1383_s4 = inlined_call_operand.vmem [shape: f32[1,32], index: 4, kind: input, shape index: {}]   ;;  %s1384_s5 = inlined_call_operand.vmem [shape: bf16[32,32], index: 5, kind: input, shape index: {}]   ;;  %s1385_s6 = inlined_call_operand.vmem [shape: f32[1,32], index: 6, kind: input, shape index: {}]   ;;  %s1386_s7 = inlined_call_operand.vmem [shape: bf16[32,128], index: 7, kind: input, shape index: {}]   ;;  %s1387_s8 = inlined_call_operand.vmem [shape: f32[1,128], index: 8, kind: input, shape index: {}]   ;;  %s1388_s9 = inlined_call_operand.hbm [shape: f32[128,128], index: 9, kind: output, shape index: {}]  }
   0x1   :  { %16 = vsyncpa [#allocation3 + $0x1], 0  ;;  %s1224_s30 = smov 0   ;;  %s1226_s10 = smov 0  }
   0x2   :  { %s1228_s11 = smov 0   ;;  %s1230_s12 = smov 0  }
   0x3 LB: > { %s1245_s13 = sadd.s32 4294967295, %s1169_s12   ;;  %s925_s14 = sadd.s32 4294967294, %s1169_s12   ;;  %s1169_s12 = sphi %s1230_s12, %s1394_s12   ;;  %s1165_s11 = sphi %s1228_s11, %s1393_s11   ;;  %s1161_s10 = sphi %s1226_s10, %s1392_s10   ;;  %s1157_s30 = sphi %s1224_s30, %s1391_s30  }
   0x4   : > { %s1249_s15 = sadd.s32 1, %s1169_s12   ;;  %s228_s16 = sadd.s32 1, %s1165_s11 }
   0x5   : > { %s225_s17 = ssub.s32 %s1169_s12, %s1249_s15  ;;  %p238_p0 = scmp.ne.s32.totalorder %s1165_s11, %s1161_s10 }
   0x6   : > { %p226_p1 = scmp.eq.s32.totalorder %s225_s17, 0  ;;  %p239_p2 = scmp.eq.s32.totalorder %s1245_s13, 1 }
   0x7   : > { %p244_p3 = scmp.ne.s32.totalorder %s1161_s10, %s1157_s30  ;;  %p245_p4 = scmp.eq.s32.totalorder %s925_s14, 1 }
   0x8   : > { %s1260_s18 = scalar_select %p226_p1, %s1165_s11, %s228_s16  }
   0x9   : > { %p1262_p5 = por %p239_p2, %p238_p0  ;;  %p1266_p6 = por %p245_p4, %p244_p3 }
   0xa   : > { %p928_p7 = scmp.ge.s32.totalorder %s1169_s12, 1  ;;  %p302_p8 = scmp.lt.s32.totalorder %s1169_s12, 3 }
   0xc   : > { %p303_p9 = pnand %p928_p7, %p302_p8 }
   0xd   : > { %v376_v0 = vld [vmem:[%s1382_s3] sm:$0xf] (!%p303_p9)  ;;  %vm410_vm0 = vcmask (!%p303_p9), 1043456   ;;  %s930_s23 = sshll.u32 (!%p303_p9), %s1245_s13, 3  ;;  %vm397_vm1 = vcmask (!%p303_p9), 64512   ;;  %vm508_vm2 = vcmask (!%p303_p9), 195584  }
   0xe   : > { %306 = sbr.rel (%p303_p9) target bundleno = 726 (0x2d6), region = 56  ;;  %v1094_v1 = vld [vmem:[%s1381_s2] sm:$0xff] (!%p303_p9)   ;;  %1050 = vmatprep.subr.msk.bf16.mxu0 (!%p303_p9), %vm410_vm0, %v376_v0  ;;  %v412_v2 = vsel (!%p303_p9), %vm410_vm0, %v376_v0, 0  ;;  %p344_p10 = scmp.lt.s32.totalorder (!%p303_p9), %s930_s23, 15  ;;  %v1097_v3 = vld [vmem:[%s1381_s2 + $0x8] ss:$0 sps:$4 sm:$0xff] (!%p303_p9)  }
   0xf   : > { %997 = vmatpush3.bf16.msra.mxu0 (!%p303_p9), %v412_v2  ;;  %v522_v7 = vsel (!%p303_p9), %vm410_vm0, %v1097_v3, 0  ;;  %v1103_v13 = vld [vmem:[%s1384_s5] sm:$0xff] (!%p303_p9)   ;;  %v1104_v14 = vld [vmem:[%s1384_s5 + $0x8] sm:$0xff] (!%p303_p9)   ;;  %vm639_vm3 = vcmask (!%p303_p9), 261120   ;;  %s972_s28 = sshll.u32 (!%p303_p9), %s1245_s13, 10 }
  0x10   : > { %1006 = vmatprep.subr.bf16.mxu0 (!%p303_p9), %v1094_v1  ;;  %1018 = vmatprep.subr.bf16.mxu1 (!%p303_p9), %v1103_v13  ;;  %v1105_v15 = vld [vmem:[%s1386_s7] sm:$0xff] (!%p303_p9)   ;;  %v1106_v45 = vld [vmem:[%s1386_s7 + $0x8] sm:$0xff] (!%p303_p9)   ;;  %s1332_s17 = scalar_lea.hbm (!%p303_p9), %s1388_s9, %s972_s28 }
  0x11   : > { %1019 = vmatpush3.bf16.msra.mxu1 (!%p303_p9), %v1103_v13  ;;  %v952_v16 = vld [vmem:[%s1383_s4] ss:$0 sm:$0xff] (!%p303_p9) }
  0x12   : > { %1020 = vmatprep.subr.bf16.mxu1 (!%p303_p9), %v1104_v14  ;;  %v953_v46 = vld [vmem:[%s1385_s6] ss:$0 sm:$0xff] (!%p303_p9) }
  0x15   : > { %s1396_s23 = smov (!%p344_p10, %s930_s23), 15  ;;  %1021 = vmatpush3.bf16.msra.mxu1 %v1104_v14 }
  0x16   : > { %s931_s26 = sshll.u32 %s1396_s23, 2  ;;  %1030 = vmatprep.subr.bf16.mxu1 %v1105_v15  ;;  %s340_s23 = sand.u32 1, %s1161_s10  }
  0x17   : > { %s353_s29 = scalar_lea.vmem %s1380_s1, %s931_s26  ;;  %s347_s22 = scalar_lea.vmem %s1379_s0, %s931_s26 }
  0x18   : > { %v1093_v4 = vld [vmem:[%s353_s29] sm:$0xff]   ;;  %v1095_v5 = vld [vmem:[%s353_s29 + $0x8] sm:$0xff]   ;;  %v1096_v6 = vld [vmem:[%s353_s29 + $0x10] sm:$0xff]   ;;  %s929_s24 = sshll.u32 %s340_s23, 6  ;;  %s1338_s13 = scalar_lea.sflag [#allocation3], %s340_s23 }
  0x19   : > { %998 = vmatprep.mubr.msk.bf16.mxu0 %vm397_vm1, %v1093_v4  ;;  %v1098_v8 = vld [vmem:[%s353_s29 + $0x18] sm:$0xff]   ;;  %v1099_v9 = vld [vmem:[%s347_s22] sm:$0xff]   ;;  %v1100_v10 = vld [vmem:[%s347_s22 + $0x8] sm:$0xff]   ;;  %s342_s27 = scalar_lea.vmem [#allocation2], %s929_s24 }
  0x1a   : > { %999 = vmatmul.mubr.msk.bf16.vlgmr.msra.gmra.mrb[0].mxu0 %vm397_vm1, %v1095_v5  ;;  %v1101_v11 = vld [vmem:[%s347_s22 + $0x10] sm:$0xff]   ;;  %v1102_v12 = vld [vmem:[%s347_s22 + $0x18] sm:$0xff]   ;;  %s851_s29 = sshll.u32 %s342_s27, 4  ;;  %s1171_s22 = smov [#allocation2]   ;;  %s1334_s29 = int_to_ptr.vmem [resolvable:$true] %s851_s29 }
  0x1b   : > { %1007 = vmatpush3.bf16.msra.mxu0 %v1094_v1  ;;  %1002 = vmatprep.mubr.msk.bf16.mxu0 %vm397_vm1, %v1096_v6  ;;  %s1107_s21 = scalar_lea.vmem %s1334_s29, 1024  ;;  %s1111_s24 = sshll.u32 %s1171_s22, 4  ;;  %s1112_s24 = int_to_ptr.vmem [resolvable:$false] %s1111_s24 }
  0x1c   : > { %1051 = vmatprep.subr.msk.bf16.mxu0 %vm410_vm0, %v1097_v3  ;;  %p1108_p11 = scmp.ne.s32.totalorder %s1334_s29, %s1107_s21  ;;  %s1113_s25 = scalar_lea.vmem %s1112_s24, 2048 }
  0x1d   : > { %p1114_p0 = scmp.lt.s32.totalorder %s1334_s29, %s1112_s24  ;;  %p1115_p1 = scmp.lt.s32.totalorder %s1113_s25, %s1107_s21 }
  0x1e   : > { %p1109_p12 = pnand %p1108_p11, %p1262_p5 }
  0x1f   : > { %1009 = vmatpush3.bf16.msra.mxu0 %v522_v7  ;;  %p1116_p2 = por %p1115_p1, %p1114_p0 }
  0x20   : > { %p1110_p13 = pneg %p1109_p12 }
  0x22   : > { %1003 = vmatmul.mubr.msk.bf16.gmra.mrb[4].mxu0 %vm397_vm1, %v1098_v8  ;;  %p1117_p3 = pnand %p1116_p2, %p1110_p13 }
  0x23   : > { %1010 = vmatprep.mubr.msk.bf16.mxu0 %vm508_vm2, %v1099_v9 }
  0x2a   : > { %1011 = vmatmul.mubr.msk.bf16.vlgmr.msra.gmra.mrb[0].mxu0 %vm508_vm2, %v1100_v10 }
  0x2b   : > { %1014 = vmatprep.mubr.msk.bf16.mxu0 %vm508_vm2, %v1101_v11  ;;  %v960_v11 = vld [vmem:[%s1387_s8] ss:$0 sm:$0xff] }
  0x32   : > { %1015 = vmatmul.mubr.msk.bf16.gmra.mrb[4].mxu0 %vm508_vm2, %v1102_v12 }
  0xfd   : > { %v1012_v17 = vpop.f32.mrb[0].mxu0 }
  0xfe   : > { %v598_v18 = vadd.f32 %v1012_v17, %v952_v16  ;;  %v558_v19 = vpop.f32.mrb[1].mxu0 }
  0xff   : > { %v596_v20 = vadd.f32 %v952_v16, %v558_v19  ;;  %v1013_v21 = vpop.f32.mrb[2].mxu0 }
 0x100   : > { %v599_v22 = vadd.f32 %v1013_v21, %v952_v16  ;;  %v561_v23 = vpop.f32.mrb[3].mxu0  ;;  %v606_v25 = vmax.f32 %v598_v18, 0.0 }
 0x101   : > { %v597_v24 = vadd.f32 %v952_v16, %v561_v23  ;;  %v604_v27 = vmax.f32 %v596_v20, 0.0 }
 0x102   : > { %v607_v26 = vmax.f32 %v599_v22, 0.0 }
 0x103   : > { %v605_v28 = vmax.f32 %v597_v24, 0.0 }
 0x104   : > { %v613_v29 = vpack.c.bf16 %v607_v26, %v606_v25 }
 0x105   : > { %v1016_v30 = vpop.f32.mrb[4].mxu0  ;;  %v612_v31 = vpack.c.bf16 %v605_v28, %v604_v27 }
 0x106   : > { %v602_v32 = vadd.f32 %v1016_v30, %v952_v16  ;;  %v574_v33 = vpop.f32.mrb[5].mxu0 }
 0x107   : > { %v600_v34 = vadd.f32 %v952_v16, %v574_v33  ;;  %v1017_v35 = vpop.f32.mrb[6].mxu0  ;;  %1022 = vmatprep.mubr.msk.bf16.mxu1 %vm639_vm3, %v612_v31 }
 0x108   : > { %v603_v36 = vadd.f32 %v1017_v35, %v952_v16  ;;  %v577_v37 = vpop.f32.mrb[7].mxu0  ;;  %1023 = vmatmul.mubr.msk.bf16.vlgmr.msra.gmra.mrb[0].mxu1 %vm639_vm3, %v613_v29  ;;  %v610_v39 = vmax.f32 %v602_v32, 0.0 }
 0x109   : > { %v601_v38 = vadd.f32 %v952_v16, %v577_v37  ;;  %1031 = vmatpush3.bf16.msra.mxu1 %v1105_v15  ;;  %v608_v41 = vmax.f32 %v600_v34, 0.0 }
 0x10a   : > { %v611_v40 = vmax.f32 %v603_v36, 0.0  ;;  %1032 = vmatprep.subr.bf16.mxu1 %v1106_v45 }
 0x10b   : > { %v609_v42 = vmax.f32 %v601_v38, 0.0 }
 0x10c   : > { %v615_v43 = vpack.c.bf16 %v611_v40, %v610_v39 }
 0x10d   : > { %v614_v44 = vpack.c.bf16 %v609_v42, %v608_v41  ;;  %1033 = vmatpush3.bf16.msra.mxu1 %v1106_v45 }
 0x10f   : > { %1026 = vmatprep.mubr.msk.bf16.mxu1 %vm639_vm3, %v614_v44 }
 0x110   : > { %1027 = vmatmul.mubr.msk.bf16.gmra.mrb[4].mxu1 %vm639_vm3, %v615_v43 }
 0x1db   : > { %v1024_v47 = vpop.f32.mrb[0].mxu1 }
 0x1dc   : > { %v695_v48 = vadd.f32 %v1024_v47, %v953_v46  ;;  %v686_v49 = vpop.f32.mrb[1].mxu1 }
 0x1dd   : > { %v687_v50 = vadd.f32 %v953_v46, %v686_v49  ;;  %v1025_v51 = vpop.f32.mrb[2].mxu1 }
 0x1de   : > { %v698_v52 = vadd.f32 %v1025_v51, %v953_v46  ;;  %v689_v53 = vpop.f32.mrb[3].mxu1  ;;  %v719_v55 = vmax.f32 %v695_v48, 0.0 }
 0x1df   : > { %v690_v54 = vadd.f32 %v953_v46, %v689_v53  ;;  %v717_v57 = vmax.f32 %v687_v50, 0.0 }
 0x1e0   : > { %v720_v56 = vmax.f32 %v698_v52, 0.0 }
 0x1e1   : > { %v718_v58 = vmax.f32 %v690_v54, 0.0 }
 0x1e2   : > { %v726_v59 = vpack.c.bf16 %v720_v56, %v719_v55 }
 0x1e3   : > { %v725_v60 = vpack.c.bf16 %v718_v58, %v717_v57  ;;  %v1028_v61 = vpop.f32.mrb[4].mxu1 }
 0x1e4   : > { %v711_v62 = vadd.f32 %v1028_v61, %v953_v46  ;;  %v702_v63 = vpop.f32.mrb[5].mxu1 }
 0x1e5   : > { %v703_v0 = vadd.f32 %v953_v46, %v702_v63  ;;  %v1029_v1 = vpop.f32.mrb[6].mxu1  ;;  %1034 = vmatprep.mubr.msk.bf16.mxu1 %vm639_vm3, %v725_v60 }
 0x1e6   : > { %v714_v2 = vadd.f32 %v1029_v1, %v953_v46  ;;  %v705_v3 = vpop.f32.mrb[7].mxu1  ;;  %1035 = vmatmul.mubr.msk.bf16.vlgmr.msra.gmra.mrb[8].mxu1 %vm639_vm3, %v726_v59  ;;  %v723_v5 = vmax.f32 %v711_v62, 0.0 }
 0x1e7   : > { %v706_v4 = vadd.f32 %v953_v46, %v705_v3  ;;  %v721_v7 = vmax.f32 %v703_v0, 0.0 }
 0x1e8   : > { %v724_v6 = vmax.f32 %v714_v2, 0.0 }
 0x1e9   : > { %v722_v8 = vmax.f32 %v706_v4, 0.0 }
 0x1ea   : > { %v728_v9 = vpack.c.bf16 %v724_v6, %v723_v5 }
 0x1eb   : > { %v727_v10 = vpack.c.bf16 %v722_v8, %v721_v7 }
 0x1ed   : > { %1038 = vmatprep.mubr.msk.bf16.mxu1 %vm639_vm3, %v727_v10 }
 0x1ee   : > { %1039 = vmatmul.mubr.msk.bf16.gmra.mrb[12].mxu1 %vm639_vm3, %v728_v9 }
 0x2b9   : > { %v1036_v12 = vpop.f32.mrb[8].mxu1 }
 0x2ba   : > { %v807_v13 = vadd.f32 %v1036_v12, %v960_v11  ;;  %v798_v14 = vpop.f32.mrb[9].mxu1 }
 0x2bb   : > { %v799_v15 = vadd.f32 %v960_v11, %v798_v14  ;;  %v1037_v16 = vpop.f32.mrb[10].mxu1 }
 0x2bc   : > { %831 = vst [vmem:[%s342_s27 + $0x10] sm:$0xff] %v807_v13  ;;  %v810_v17 = vadd.f32 %v1037_v16, %v960_v11  ;;  %v801_v18 = vpop.f32.mrb[11].mxu1 }
 0x2bd   : > { %829 = vst [vmem:[%s342_s27] sm:$0xff] %v799_v15  ;;  %v802_v19 = vadd.f32 %v960_v11, %v801_v18 }
 0x2be   : > { %832 = vst [vmem:[%s342_s27 + $0x18] sm:$0xff] %v810_v17 }
 0x2bf   : > { %830 = vst [vmem:[%s342_s27 + $0x8] sm:$0xff] %v802_v19 }
 0x2c1   : > { %v1040_v20 = vpop.f32.mrb[12].mxu1 }
 0x2c2   : > { %v823_v21 = vadd.f32 %v1040_v20, %v960_v11  ;;  %v814_v22 = vpop.f32.mrb[13].mxu1 }
 0x2c3   : > { %v815_v23 = vadd.f32 %v960_v11, %v814_v22  ;;  %v1041_v24 = vpop.f32.mrb[14].mxu1 }
 0x2c4   : > { %835 = vst [vmem:[%s342_s27 + $0x30] sm:$0xff] %v823_v21  ;;  %v826_v25 = vadd.f32 %v1041_v24, %v960_v11  ;;  %v817_v26 = vpop.f32.mrb[15].mxu1 }
 0x2c5   : > { %833 = vst [vmem:[%s342_s27 + $0x20] sm:$0xff] %v815_v23  ;;  %v818_v27 = vadd.f32 %v960_v11, %v817_v26 }
 0x2c6   : > { %836 = vst [vmem:[%s342_s27 + $0x38] sm:$0xff] %v826_v25 }
 0x2c7   : > { %834 = vst [vmem:[%s342_s27 + $0x28] sm:$0xff] %v818_v27 }
 0x2c8   : > { %1120 = shalt.err (!%p1117_p3)
}
 0x2c9   : > { %s1121_s23 = scalar_lea.hbm %s1332_s17, 1024  ;;  %s1125_s28 = scalar_lea.hbm %s1388_s9, 2048 }
 0x2ca   : > { %p1122_p4 = scmp.ne.s32.totalorder %s1332_s17, %s1121_s23  ;;  %p1126_p9 = scmp.lt.u32.totalorder %s1332_s17, %s1388_s9 }
 0x2cb   : > { %p1127_p10 = scmp.lt.u32.totalorder %s1125_s28, %s1121_s23  ;;  %p1129_p12 = scmp.lt.u32.totalorder %s1121_s23, %s1332_s17 }
 0x2cc   : > { %p1123_p7 = pnand %p1122_p4, %p1262_p5 }
 0x2cd   : > { %p1128_p11 = por %p1127_p10, %p1126_p9 }
 0x2ce   : > { %p1124_p8 = pneg %p1123_p7 }
 0x2cf   : > { %p1130_p13 = por %p1129_p12, %p1128_p11 }
 0x2d1   : > { %p1131_p0 = pnand %p1130_p13, %p1124_p8 }
 0x2d3   : > { %1134 = shalt.err (!%p1131_p0)
}
 0x2d4   : > { %s1172_s21 = smov 128   ;;  %s1173_s22 = smov 8  }
 0x2d5   : > { %1052 = dma.vmem_to_hbm [thread:$0]  (%p1262_p5), %s1334_s29, 1024, %s1332_s17, %s1338_s13, %s1172_s21, %s1172_s21, %s1173_s22  }
 0x2d6 PF: > { %p1058_p1 = scmp.ge.s32.totalorder %s1169_s12, 2  ;;  %s866_s24 = sand.u32 1, %s1157_s30  }
 0x2d7   : > { %s867_s25 = scalar_lea.sflag [#allocation3], %s866_s24 }
 0x2d8   : > { %p1055_p2 = pnand %p1058_p1, %p1266_p6 }
 0x2da   : > { %1152 = dma.done.wait (!%p1055_p2), %s867_s25, 1024  }
 0x2db   : > { %1154 = vsyncadd (!%p1055_p2), %s867_s25, 4294966272  ;;  %p19_p3 = scmp.ge.s32.totalorder %s1249_s15, 4   ;;  %s1391_s30 = smov %s1161_s10 }
 0x2dc   : > { %s1392_s10 = smov %s1165_s11  ;;  %s1393_s11 = smov %s1260_s18 }
 0x2dd   : > { %s1394_s12 = smov %s1249_s15  ;;  %21 = sbr.rel (!%p19_p3) target bundleno = 3 (0x3), region = 94 }
 0x2e4   :  { %872 = vsyncpa [#allocation3], 1 }
 0x2e5   :  { %874 = vsyncpa [#allocation3 + $0x1], 1 }

</bundles_post_ra>
